<compile_context>
chip_gen: v7x
topology: tpu7x:2x2x1
jax: 0.10.0
libtpu: 0.0.40
codegen_flags: <defaults>
</compile_context>

<pallas_src>
import functools

import jax
import jax.numpy as jnp
import numpy as np
from jax.experimental import pallas as pl
from jax.experimental.pallas import tpu as pltpu


HID1 = 400
HID2 = 300

_LANE = 128
_SUBLANE = 8


def _round_up(n, m):
    return (n + m - 1) // m * m


H1P = _round_up(HID1, _LANE)   # 512
H2P = _round_up(HID2, _LANE)   # 384


def _policy_actor_kernel(x_ref, w1_ref, b1_ref, w2_ref, b2_ref,
                         wh_ref, bh_ref, out_ref, *, hp):
    """One batch tile of the full MLP. All weights are VMEM-resident."""
    x = x_ref[...]

    h1 = jnp.dot(x, w1_ref[...], preferred_element_type=jnp.float32) + b1_ref[...]
    h1 = jnp.maximum(h1, 0.0)

    h2 = jnp.dot(h1, w2_ref[...], preferred_element_type=jnp.float32) + b2_ref[...]
    h2 = jnp.maximum(h2, 0.0)

    # Fused heads: columns [0:hp) -> mean, [hp:2hp) -> log_std (both lane-padded).
    heads = jnp.dot(h2, wh_ref[...], preferred_element_type=jnp.float32) + bh_ref[...]

    mean = heads[:, :hp]
    log_std = jnp.clip(heads[:, hp:], -20.0, 2.0)

    # Lane-aligned (128-multiple) stores into a single lane-dense output slab.
    out_ref[:, :hp] = mean.astype(out_ref.dtype)
    out_ref[:, hp:] = jnp.exp(log_std).astype(out_ref.dtype)


def _pack_params(params, act_dim):
    """Zero-pad hidden dims to lane multiples and fuse the two heads.

    Zero padding is semantically inert: padded h1/h2 columns are relu(0)=0 and
    multiply against zero weight rows downstream; padded head columns are
    sliced off in the wrapper.
    """
    hp = _round_up(act_dim, _LANE)
    obs_dim = params["w1"].shape[0]

    w1p = jnp.zeros((obs_dim, H1P), jnp.float32).at[:, :HID1].set(params["w1"])
    b1p = jnp.zeros((1, H1P), jnp.float32).at[:, :HID1].set(params["b1"])

    w2p = jnp.zeros((H1P, H2P), jnp.float32).at[:HID1, :HID2].set(params["w2"])
    b2p = jnp.zeros((1, H2P), jnp.float32).at[:, :HID2].set(params["b2"])

    whp = (jnp.zeros((H2P, 2 * hp), jnp.float32)
           .at[:HID2, :act_dim].set(params["wm"])
           .at[:HID2, hp:hp + act_dim].set(params["ws"]))
    bhp = (jnp.zeros((1, 2 * hp), jnp.float32)
           .at[:, :act_dim].set(params["bm"])
           .at[:, hp:hp + act_dim].set(params["bs"]))

    return w1p, b1p, w2p, b2p, whp, bhp, hp


def policy_actor_forward(x, params, *, block_batch=256):
    """x: [batch, obs_dim] f32. params: dict of (unpadded) weights/biases.

    Returns (mean, std), each [batch, act_dim] f32.
    """
    batch, obs_dim = x.shape
    act_dim = params["wm"].shape[1]

    w1p, b1p, w2p, b2p, whp, bhp, hp = _pack_params(params, act_dim)

    # Batch tiling: pad rows to a sublane multiple, tile with TB rows.
    b8 = _round_up(batch, _SUBLANE)
    tb = min(block_batch, b8)
    bp = _round_up(b8, tb)
    if bp != batch:
        x = jnp.pad(x, ((0, bp - batch), (0, 0)))
    grid = (bp // tb,)

    kernel = functools.partial(_policy_actor_kernel, hp=hp)

    out = pl.pallas_call(
        kernel,
        grid=grid,
        in_specs=[
            # x streams per batch tile; weights/biases stay VMEM-resident.
            pl.BlockSpec((tb, obs_dim), lambda i: (i, 0)),
            pl.BlockSpec((obs_dim, H1P), lambda i: (0, 0)),
            pl.BlockSpec((1, H1P), lambda i: (0, 0)),
            pl.BlockSpec((H1P, H2P), lambda i: (0, 0)),
            pl.BlockSpec((1, H2P), lambda i: (0, 0)),
            pl.BlockSpec((H2P, 2 * hp), lambda i: (0, 0)),
            pl.BlockSpec((1, 2 * hp), lambda i: (0, 0)),
        ],
        out_specs=pl.BlockSpec((tb, 2 * hp), lambda i: (i, 0)),
        out_shape=jax.ShapeDtypeStruct((bp, 2 * hp), jnp.float32),
        compiler_params=pltpu.CompilerParams(
            dimension_semantics=("parallel",),          # shard tiles across TCs (v7x)
            vmem_limit_bytes=32 * 1024 * 1024),         # explicit; ~2 MiB actually used
    )(x, w1p, b1p, w2p, b2p, whp, bhp)

    mean = out[:batch, :act_dim]
    std = out[:batch, hp:hp + act_dim]
    return mean, std


def init_params(key, obs_dim, act_dim):
    """Deterministic init mirroring the PyTorch module's __init__.

    fanin_init(size) with size = (out, in) uses fanin = size[0] = out_features;
    biases keep nn.Linear's default U(-1/sqrt(in), 1/sqrt(in)).
    Weights are stored transposed ([in, out]) for the kernel (y = x @ W + b).
    """
    ks = jax.random.split(key, 8)

    def u(k, shape, bound):
        return jax.random.uniform(k, shape, jnp.float32, -bound, bound)

    params = {
        # fc1: PyTorch weight shape (400, obs_dim) -> fanin = 400
        "w1": u(ks[0], (obs_dim, HID1), 1.0 / np.sqrt(HID1)),
        "b1": u(ks[1], (1, HID1), 1.0 / np.sqrt(obs_dim)),
        # fc2: PyTorch weight shape (300, 400) -> fanin = 300
        "w2": u(ks[2], (HID1, HID2), 1.0 / np.sqrt(HID2)),
        "b2": u(ks[3], (1, HID2), 1.0 / np.sqrt(HID1)),
        # mean / log_std heads: uniform(-0.003, 0.003) weights
        "wm": u(ks[4], (HID2, act_dim), 0.003),
        "bm": u(ks[5], (1, act_dim), 1.0 / np.sqrt(HID2)),
        "ws": u(ks[6], (HID2, act_dim), 0.003),
        "bs": u(ks[7], (1, act_dim), 1.0 / np.sqrt(HID2)),
    }
    return params


def reference_forward(x, params):
    h1 = jnp.maximum(x @ params["w1"] + params["b1"], 0.0)
    h2 = jnp.maximum(h1 @ params["w2"] + params["b2"], 0.0)
    mean = h2 @ params["wm"] + params["bm"]
    log_std = jnp.clip(h2 @ params["ws"] + params["bs"], -20.0, 2.0)
    return mean, jnp.exp(log_std)


if __name__ == "__main__":
    # Small shapes consistent with PandaReach-style vector observations.
    obs_dim, act_dim = 16, 4
    act_limit = 1.0  # used only by get_action (sampling), not by forward

    key = jax.random.PRNGKey(0)
    k_param, k_x1, k_x2 = jax.random.split(key, 3)
    params = init_params(k_param, obs_dim, act_dim)

    fwd = jax.jit(functools.partial(policy_actor_forward))

    # Case 1: tiny inference batch (single grid step).
    x_small = jax.random.normal(k_x1, (8, obs_dim), jnp.float32)
    mean, std = fwd(x_small, params)
    jax.block_until_ready((mean, std))
    mean_ref, std_ref = reference_forward(x_small, params)
    np.testing.assert_allclose(np.asarray(mean), np.asarray(mean_ref),
                               rtol=1e-5, atol=1e-5)
    np.testing.assert_allclose(np.asarray(std), np.asarray(std_ref),
                               rtol=1e-5, atol=1e-5)

    # Case 2: PPO-minibatch-sized batch exercising the batch grid (grid > 1)
    # and the batch-padding / output-slicing path.
    x_big = jax.random.normal(k_x2, (300, obs_dim), jnp.float32)
    mean_b, std_b = fwd(x_big, params)
    jax.block_until_ready((mean_b, std_b))
    mean_b_ref, std_b_ref = reference_forward(x_big, params)
    np.testing.assert_allclose(np.asarray(mean_b), np.asarray(mean_b_ref),
                               rtol=1e-5, atol=1e-5)
    np.testing.assert_allclose(np.asarray(std_b), np.asarray(std_b_ref),
                               rtol=1e-5, atol=1e-5)

    # TODO(synk): get_action's Normal sampling / log_prob is host-side glue,
    # not part of the forward-pass kernel.
    print("KERNEL_OK")
</pallas_src>

<mosaic_0001>
module attributes {stable_mosaic.version = 11 : i64} {
  func.func @_policy_actor_kernel(%arg0: i32, %arg1: memref<8x16xf32, #tpu.memory_space<vmem>>, %arg2: memref<16x512xf32, #tpu.memory_space<vmem>>, %arg3: memref<1x512xf32, #tpu.memory_space<vmem>>, %arg4: memref<512x384xf32, #tpu.memory_space<vmem>>, %arg5: memref<1x384xf32, #tpu.memory_space<vmem>>, %arg6: memref<384x256xf32, #tpu.memory_space<vmem>>, %arg7: memref<1x256xf32, #tpu.memory_space<vmem>>, %arg8: memref<8x256xf32, #tpu.memory_space<vmem>>) attributes {dimension_semantics = [#tpu.dimension_semantics<parallel>], iteration_bounds = array<i64: 1>, scalar_prefetch = 0 : i64, scratch_operands = 0 : i64, tpu.core_type = #tpu.core_type<tc>, window_params = [{transform_indices = @transform_0, window_bounds = array<i64: 8, 16>}, {pipeline_mode = #tpu.pipeline_mode<synchronous>, transform_indices = @transform_1, window_bounds = array<i64: 16, 512>}, {pipeline_mode = #tpu.pipeline_mode<synchronous>, transform_indices = @transform_2, window_bounds = array<i64: 1, 512>}, {pipeline_mode = #tpu.pipeline_mode<synchronous>, transform_indices = @transform_3, window_bounds = array<i64: 512, 384>}, {pipeline_mode = #tpu.pipeline_mode<synchronous>, transform_indices = @transform_4, window_bounds = array<i64: 1, 384>}, {pipeline_mode = #tpu.pipeline_mode<synchronous>, transform_indices = @transform_5, window_bounds = array<i64: 384, 256>}, {pipeline_mode = #tpu.pipeline_mode<synchronous>, transform_indices = @transform_6, window_bounds = array<i64: 1, 256>}, {transform_indices = @transform_7, window_bounds = array<i64: 8, 256>}]} {
    %c0 = arith.constant 0 : index
    %c0_0 = arith.constant 0 : index
    %0 = vector.load %arg1[%c0, %c0_0] : memref<8x16xf32, #tpu.memory_space<vmem>>, vector<8x16xf32>
    %c0_1 = arith.constant 0 : index
    %c0_2 = arith.constant 0 : index
    %1 = vector.load %arg2[%c0_1, %c0_2] : memref<16x512xf32, #tpu.memory_space<vmem>>, vector<16x512xf32>
    %cst = arith.constant dense<0.000000e+00> : vector<8x512xf32>
    %2 = tpu.matmul %0, %1, %cst {dimension_numbers = #tpu.dot_dimension_numbers<[1], [0], [0], [1], [0, 0, 1, 1], [], []>} : vector<8x16xf32>, vector<16x512xf32>, vector<8x512xf32> -> vector<8x512xf32>
    %c0_3 = arith.constant 0 : index
    %c0_4 = arith.constant 0 : index
    %3 = vector.load %arg3[%c0_3, %c0_4] : memref<1x512xf32, #tpu.memory_space<vmem>>, vector<1x512xf32>
    %4 = vector.broadcast %3 : vector<1x512xf32> to vector<8x512xf32>
    %5 = arith.addf %2, %4 : vector<8x512xf32>
    %cst_5 = arith.constant 0.000000e+00 : f32
    %6 = vector.broadcast %cst_5 : f32 to vector<8x512xf32>
    %7 = arith.maximumf %5, %6 : vector<8x512xf32>
    %c0_6 = arith.constant 0 : index
    %c0_7 = arith.constant 0 : index
    %8 = vector.load %arg4[%c0_6, %c0_7] : memref<512x384xf32, #tpu.memory_space<vmem>>, vector<512x384xf32>
    %cst_8 = arith.constant dense<0.000000e+00> : vector<8x384xf32>
    %9 = tpu.matmul %7, %8, %cst_8 {dimension_numbers = #tpu.dot_dimension_numbers<[1], [0], [0], [1], [0, 0, 1, 1], [], []>} : vector<8x512xf32>, vector<512x384xf32>, vector<8x384xf32> -> vector<8x384xf32>
    %c0_9 = arith.constant 0 : index
    %c0_10 = arith.constant 0 : index
    %10 = vector.load %arg5[%c0_9, %c0_10] : memref<1x384xf32, #tpu.memory_space<vmem>>, vector<1x384xf32>
    %11 = vector.broadcast %10 : vector<1x384xf32> to vector<8x384xf32>
    %12 = arith.addf %9, %11 : vector<8x384xf32>
    %cst_11 = arith.constant 0.000000e+00 : f32
    %13 = vector.broadcast %cst_11 : f32 to vector<8x384xf32>
    %14 = arith.maximumf %12, %13 : vector<8x384xf32>
    %c0_12 = arith.constant 0 : index
    %c0_13 = arith.constant 0 : index
    %15 = vector.load %arg6[%c0_12, %c0_13] : memref<384x256xf32, #tpu.memory_space<vmem>>, vector<384x256xf32>
    %cst_14 = arith.constant dense<0.000000e+00> : vector<8x256xf32>
    %16 = tpu.matmul %14, %15, %cst_14 {dimension_numbers = #tpu.dot_dimension_numbers<[1], [0], [0], [1], [0, 0, 1, 1], [], []>} : vector<8x384xf32>, vector<384x256xf32>, vector<8x256xf32> -> vector<8x256xf32>
    %c0_15 = arith.constant 0 : index
    %c0_16 = arith.constant 0 : index
    %17 = vector.load %arg7[%c0_15, %c0_16] : memref<1x256xf32, #tpu.memory_space<vmem>>, vector<1x256xf32>
    %18 = vector.broadcast %17 : vector<1x256xf32> to vector<8x256xf32>
    %19 = arith.addf %16, %18 : vector<8x256xf32>
    %20 = vector.extract_strided_slice %19 {offsets = [0, 0], sizes = [8, 128], strides = [1, 1]} : vector<8x256xf32> to vector<8x128xf32>
    %21 = vector.extract_strided_slice %19 {offsets = [0, 128], sizes = [8, 128], strides = [1, 1]} : vector<8x256xf32> to vector<8x128xf32>
    %cst_17 = arith.constant -2.000000e+01 : f32
    %cst_18 = arith.constant 2.000000e+00 : f32
    %22 = vector.broadcast %cst_17 : f32 to vector<8x128xf32>
    %23 = arith.maximumf %22, %21 : vector<8x128xf32>
    %24 = vector.broadcast %cst_18 : f32 to vector<8x128xf32>
    %25 = arith.minimumf %24, %23 : vector<8x128xf32>
    %c0_19 = arith.constant 0 : index
    %c0_20 = arith.constant 0 : index
    %26 = vector.load %arg8[%c0_19, %c0_20] : memref<8x256xf32, #tpu.memory_space<vmem>>, vector<8x128xf32>
    tpu.vector_store %arg8[%c0_19, %c0_20], %20 {strides = array<i32>} : memref<8x256xf32, #tpu.memory_space<vmem>>, vector<8x128xf32>,
    %27 = math.exp %25 : vector<8x128xf32>
    %c0_21 = arith.constant 0 : index
    %c128 = arith.constant 128 : index
    %28 = vector.load %arg8[%c0_21, %c128] : memref<8x256xf32, #tpu.memory_space<vmem>>, vector<8x128xf32>
    tpu.vector_store %arg8[%c0_21, %c128], %27 {strides = array<i32>} : memref<8x256xf32, #tpu.memory_space<vmem>>, vector<8x128xf32>,
    return
  }
  func.func @transform_0(%arg0: i32) -> (i32, i32) {
    %c0_i32 = arith.constant 0 : i32
    %c0_i32_0 = arith.constant 0 : i32
    return %arg0, %c0_i32 : i32, i32
  }
  func.func @transform_1(%arg0: i32) -> (i32, i32) {
    %c0_i32 = arith.constant 0 : i32
    %c0_i32_0 = arith.constant 0 : i32
    %c0_i32_1 = arith.constant 0 : i32
    return %c0_i32, %c0_i32_0 : i32, i32
  }
  func.func @transform_2(%arg0: i32) -> (i32, i32) {
    %c0_i32 = arith.constant 0 : i32
    %c0_i32_0 = arith.constant 0 : i32
    %c0_i32_1 = arith.constant 0 : i32
    return %c0_i32, %c0_i32_0 : i32, i32
  }
  func.func @transform_3(%arg0: i32) -> (i32, i32) {
    %c0_i32 = arith.constant 0 : i32
    %c0_i32_0 = arith.constant 0 : i32
    %c0_i32_1 = arith.constant 0 : i32
    return %c0_i32, %c0_i32_0 : i32, i32
  }
  func.func @transform_4(%arg0: i32) -> (i32, i32) {
    %c0_i32 = arith.constant 0 : i32
    %c0_i32_0 = arith.constant 0 : i32
    %c0_i32_1 = arith.constant 0 : i32
    return %c0_i32, %c0_i32_0 : i32, i32
  }
  func.func @transform_5(%arg0: i32) -> (i32, i32) {
    %c0_i32 = arith.constant 0 : i32
    %c0_i32_0 = arith.constant 0 : i32
    %c0_i32_1 = arith.constant 0 : i32
    return %c0_i32, %c0_i32_0 : i32, i32
  }
  func.func @transform_6(%arg0: i32) -> (i32, i32) {
    %c0_i32 = arith.constant 0 : i32
    %c0_i32_0 = arith.constant 0 : i32
    %c0_i32_1 = arith.constant 0 : i32
    return %c0_i32, %c0_i32_0 : i32, i32
  }
  func.func @transform_7(%arg0: i32) -> (i32, i32) {
    %c0_i32 = arith.constant 0 : i32
    %c0_i32_0 = arith.constant 0 : i32
    return %arg0, %c0_i32 : i32, i32
  }
}

</mosaic_0001>

<bundles_post_ra>
// kernel: policy_actor_forward.1
= control target key start
LH: loop header
LB: loop body
LE: loop exit
PB: predicated region body
PF: predicated region fallthrough
CT: control target
= control target key end

     0   :  { %v1340_v3 = vmov 0.0   ;;  %vm57_vm0 = vcmask 130048   ;;  %s2327_s1 = inlined_call_operand.vmem [shape: f32[16,512], index: 1, kind: input, shape index: {}]   ;;  %s2328_s3 = inlined_call_operand.vmem [shape: f32[512,384], index: 3, kind: input, shape index: {}]   ;;  %s2329_s0 = inlined_call_operand.vmem [shape: f32[8,16], index: 0, kind: input, shape index: {}]   ;;  %s2330_s2 = inlined_call_operand.vmem [shape: f32[1,512], index: 2, kind: input, shape index: {}]   ;;  %s2331_s5 = inlined_call_operand.vmem [shape: f32[384,256], index: 5, kind: input, shape index: {}]   ;;  %s2332_s4 = inlined_call_operand.vmem [shape: f32[1,384], index: 4, kind: input, shape index: {}]   ;;  %s2333_s6 = inlined_call_operand.vmem [shape: f32[1,256], index: 6, kind: input, shape index: {}]   ;;  %s2334_s7 = inlined_call_operand.vmem [shape: f32[8,256], index: 7, kind: output, shape index: {}]  }
   0x1   :  { %v28_v0 = vld [vmem:[%s2327_s1 + $0x8] sm:$0xff]  ;;  %v27_v2 = vld [vmem:[%s2327_s1] sm:$0xff]  ;;  %125 = vmatprep.mubr.f32.mxu0 %v1340_v3  ;;  %v30_v6 = vld [vmem:[%s2327_s1 + $0x18] sm:$0xff] }
   0x2   :  { %v32_v1 = vld [vmem:[%s2327_s1 + $0x28] sm:$0xff]  ;;  %v31_v5 = vld [vmem:[%s2327_s1 + $0x20] sm:$0xff]  ;;  %v34_v8 = vld [vmem:[%s2327_s1 + $0x38] sm:$0xff] }
   0x3   :  { %v1033_v4 = vpack.c.bf16 %v32_v1, %v28_v0  ;;  %v1035_v7 = vpack.c.bf16 %v31_v5, %v27_v2  ;;  %v29_v9 = vld [vmem:[%s2327_s1 + $0x10] sm:$0xff]  ;;  %v1037_v11 = vpack.c.bf16 %v34_v8, %v30_v6  ;;  %v208_v12 = vld [vmem:[%s2328_s3 + $0x8] sm:$0xff]  ;;  %v211_v13 = vld [vmem:[%s2328_s3 + $0x20] sm:$0xff] }
   0x4   :  { %v33_v10 = vld [vmem:[%s2327_s1 + $0x30] sm:$0xff]  ;;  %v26_v14 = vld [vmem:[%s2329_s0] sm:$0xff]  ;;  %v1041_v16 = vpack.c.bf16 %v211_v13, %v208_v12  ;;  %v210_v18 = vld [vmem:[%s2328_s3 + $0x18] sm:$0xff] }
   0x5   :  { %1034 = vmatprep.subr.bf16.mxu0 %v1033_v4  ;;  %v1039_v15 = vpack.c.bf16 %v33_v10, %v29_v9  ;;  %v207_v17 = vld [vmem:[%s2328_s3] sm:$0xff]  ;;  %v214_v19 = vld [vmem:[%s2328_s3 + $0x38] sm:$0xff]  ;;  %v217_v20 = vld [vmem:[%s2328_s3 + $0x50] sm:$0xff] }
   0x6   :  { %1036 = vmatpush1.bf16.msra.mxu0 %v1035_v7  ;;  %v1043_v21 = vpack.c.bf16 %v210_v18, %v207_v17  ;;  %v1045_v22 = vpack.c.bf16 %v217_v20, %v214_v19  ;;  %v213_v23 = vld [vmem:[%s2328_s3 + $0x30] sm:$0xff]  ;;  %v216_v24 = vld [vmem:[%s2328_s3 + $0x48] sm:$0xff]  ;;  %v223_v26 = vld [vmem:[%s2328_s3 + $0x80] sm:$0xff] }
   0x7   :  { %1038 = vmatprep.subr.bf16.mxu0 %v1037_v11  ;;  %v220_v25 = vld [vmem:[%s2328_s3 + $0x68] sm:$0xff]  ;;  %v1047_v27 = vpack.c.bf16 %v216_v24, %v213_v23  ;;  %v219_v29 = vld [vmem:[%s2328_s3 + $0x60] sm:$0xff]  ;;  %v222_v30 = vld [vmem:[%s2328_s3 + $0x78] sm:$0xff] }
   0x8   :  { %v1049_v28 = vpack.c.bf16 %v223_v26, %v220_v25  ;;  %v226_v31 = vld [vmem:[%s2328_s3 + $0x98] sm:$0xff]  ;;  %v229_v32 = vld [vmem:[%s2328_s3 + $0xb0] sm:$0xff]  ;;  %v260_v34 = vld [vmem:[%s2328_s3 + $0x1a8] sm:$0xff]  ;;  %v1051_v37 = vpack.c.bf16 %v222_v30, %v219_v29 }
   0x9   :  { %961 = vmatmul.mubr.msk.f32.vlgmr.msra.gmra.mrb[0].mxu0 %vm57_vm0, %v26_v14  ;;  %v257_v33 = vld [vmem:[%s2328_s3 + $0x190] sm:$0xff]  ;;  %v228_v39 = vld [vmem:[%s2328_s3 + $0xa8] sm:$0xff]  ;;  %v1053_v41 = vpack.c.bf16 %v229_v32, %v226_v31  ;;  %v263_v44 = vld [vmem:[%s2328_s3 + $0x1c0] sm:$0xff] }
   0xa   :  { %1040 = vmatpush1.bf16.msra.mxu0 %v1039_v15  ;;  %196 = vmatprep.mubr.f32.mxu0 %v1340_v3  ;;  %v1169_v35 = vpack.c.bf16 %v260_v34, %v257_v33  ;;  %v209_v36 = vld [vmem:[%s2328_s3 + $0x10] sm:$0xff]  ;;  %v212_v40 = vld [vmem:[%s2328_s3 + $0x28] sm:$0xff]  ;;  %v266_v45 = vld [vmem:[%s2328_s3 + $0x1d8] sm:$0xff] }
   0xb   :  { %1042 = vmatprep.subr.bf16.mxu0 %v1041_v16  ;;  %v225_v38 = vld [vmem:[%s2328_s3 + $0x90] sm:$0xff]  ;;  %v232_v42 = vld [vmem:[%s2328_s3 + $0xc8] sm:$0xff]  ;;  %v1171_v43 = vpack.c.bf16 %v212_v40, %v209_v36  ;;  %v235_v46 = vld [vmem:[%s2328_s3 + $0xe0] sm:$0xff]  ;;  %v1173_v47 = vpack.c.bf16 %v266_v45, %v263_v44 }
   0xc   :  { %1170 = vmatprep.subr.bf16.mxu1 %v1169_v35  ;;  %v215_v48 = vld [vmem:[%s2328_s3 + $0x40] sm:$0xff]  ;;  %v218_v49 = vld [vmem:[%s2328_s3 + $0x58] sm:$0xff]  ;;  %v269_v51 = vld [vmem:[%s2328_s3 + $0x1f0] sm:$0xff]  ;;  %v1055_v52 = vpack.c.bf16 %v228_v39, %v225_v38  ;;  %v1057_v56 = vpack.c.bf16 %v235_v46, %v232_v42 }
   0xd   :  { %962 = vmatmul.mubr.msk.f32.vlgmr.msra.gmra.mrb[2].mxu0 %vm57_vm0, %v26_v14  ;;  %1172 = vmatpush3.bf16.msra.mxu1 %v1171_v43  ;;  %v1175_v50 = vpack.c.bf16 %v218_v49, %v215_v48  ;;  %v231_v53 = vld [vmem:[%s2328_s3 + $0xc0] sm:$0xff]  ;;  %v234_v54 = vld [vmem:[%s2328_s3 + $0xd8] sm:$0xff]  ;;  %v272_v55 = vld [vmem:[%s2328_s3 + $0x208] sm:$0xff] }
   0xe   :  { %1044 = vmatpush1.bf16.msra.mxu0 %v1043_v21  ;;  %1174 = vmatprep.subr.bf16.mxu1 %v1173_v47  ;;  %v238_v57 = vld [vmem:[%s2328_s3 + $0xf8] sm:$0xff]  ;;  %v1177_v58 = vpack.c.bf16 %v272_v55, %v269_v51  ;;  %v221_v59 = vld [vmem:[%s2328_s3 + $0x70] sm:$0xff]  ;;  %v224_v60 = vld [vmem:[%s2328_s3 + $0x88] sm:$0xff]  ;;  %v1059_v1 = vpack.c.bf16 %v234_v54, %v231_v53 }
   0xf   :  { %1046 = vmatprep.subr.bf16.mxu0 %v1045_v22  ;;  %v241_v61 = vld [vmem:[%s2328_s3 + $0x110] sm:$0xff]  ;;  %v275_v62 = vld [vmem:[%s2328_s3 + $0x220] sm:$0xff]  ;;  %v278_v63 = vld [vmem:[%s2328_s3 + $0x238] sm:$0xff]  ;;  %v1179_v0 = vpack.c.bf16 %v224_v60, %v221_v59 }
  0x10   :  { %v237_v2 = vld [vmem:[%s2328_s3 + $0xf0] sm:$0xff]  ;;  %v1181_v4 = vpack.c.bf16 %v278_v63, %v275_v62  ;;  %v227_v5 = vld [vmem:[%s2328_s3 + $0xa0] sm:$0xff]  ;;  %v230_v6 = vld [vmem:[%s2328_s3 + $0xb8] sm:$0xff]  ;;  %v1061_v7 = vpack.c.bf16 %v241_v61, %v238_v57 }
  0x11   :  { %1176 = vmatpush3.bf16.msra.mxu1 %v1175_v50  ;;  %v240_v8 = vld [vmem:[%s2328_s3 + $0x108] sm:$0xff]  ;;  %v281_v9 = vld [vmem:[%s2328_s3 + $0x250] sm:$0xff]  ;;  %v247_v12 = vld [vmem:[%s2328_s3 + $0x140] sm:$0xff]  ;;  %v1183_v13 = vpack.c.bf16 %v230_v6, %v227_v5 }
  0x12   :  { %1048 = vmatpush1.bf16.msra.mxu0 %v1047_v27  ;;  %1178 = vmatprep.subr.bf16.mxu1 %v1177_v58  ;;  %v284_v10 = vld [vmem:[%s2328_s3 + $0x268] sm:$0xff]  ;;  %v1063_v14 = vpack.c.bf16 %v240_v8, %v237_v2  ;;  %v243_v15 = vld [vmem:[%s2328_s3 + $0x120] sm:$0xff]  ;;  %v233_v17 = vld [vmem:[%s2328_s3 + $0xd0] sm:$0xff] }
  0x13   :  { %1050 = vmatprep.subr.bf16.mxu0 %v1049_v28  ;;  %v244_v11 = vld [vmem:[%s2328_s3 + $0x128] sm:$0xff]  ;;  %v1185_v16 = vpack.c.bf16 %v284_v10, %v281_v9  ;;  %v246_v20 = vld [vmem:[%s2328_s3 + $0x138] sm:$0xff]  ;;  %v287_v21 = vld [vmem:[%s2328_s3 + $0x280] sm:$0xff] }
  0x14   :  { %v236_v18 = vld [vmem:[%s2328_s3 + $0xe8] sm:$0xff]  ;;  %v1065_v19 = vpack.c.bf16 %v247_v12, %v244_v11  ;;  %v290_v22 = vld [vmem:[%s2328_s3 + $0x298] sm:$0xff]  ;;  %v253_v24 = vld [vmem:[%s2328_s3 + $0x170] sm:$0xff]  ;;  %v1067_v26 = vpack.c.bf16 %v246_v20, %v243_v15 }
  0x15   :  { %1180 = vmatpush3.bf16.msra.mxu1 %v1179_v0  ;;  %v250_v23 = vld [vmem:[%s2328_s3 + $0x158] sm:$0xff]  ;;  %v1187_v25 = vpack.c.bf16 %v236_v18, %v233_v17  ;;  %v249_v27 = vld [vmem:[%s2328_s3 + $0x150] sm:$0xff]  ;;  %v1189_v28 = vpack.c.bf16 %v290_v22, %v287_v21  ;;  %v239_v29 = vld [vmem:[%s2328_s3 + $0x100] sm:$0xff] }
  0x16   :  { %1052 = vmatpush1.bf16.msra.mxu0 %v1051_v37  ;;  %1182 = vmatprep.subr.bf16.mxu1 %v1181_v4  ;;  %v242_v30 = vld [vmem:[%s2328_s3 + $0x118] sm:$0xff]  ;;  %v1069_v31 = vpack.c.bf16 %v253_v24, %v250_v23  ;;  %v252_v32 = vld [vmem:[%s2328_s3 + $0x168] sm:$0xff]  ;;  %v293_v33 = vld [vmem:[%s2328_s3 + $0x2b0] sm:$0xff] }
  0x17   :  { %1054 = vmatprep.subr.bf16.mxu0 %v1053_v41  ;;  %v296_v34 = vld [vmem:[%s2328_s3 + $0x2c8] sm:$0xff]  ;;  %v259_v36 = vld [vmem:[%s2328_s3 + $0x1a0] sm:$0xff]  ;;  %v1191_v37 = vpack.c.bf16 %v242_v30, %v239_v29  ;;  %v1071_v38 = vpack.c.bf16 %v252_v32, %v249_v27  ;;  %v245_v40 = vld [vmem:[%s2328_s3 + $0x130] sm:$0xff] }
  0x18   :  { %v256_v35 = vld [vmem:[%s2328_s3 + $0x188] sm:$0xff]  ;;  %v1193_v39 = vpack.c.bf16 %v296_v34, %v293_v33  ;;  %v255_v43 = vld [vmem:[%s2328_s3 + $0x180] sm:$0xff]  ;;  %v258_v44 = vld [vmem:[%s2328_s3 + $0x198] sm:$0xff] }
  0x19   :  { %1184 = vmatpush3.bf16.msra.mxu1 %v1183_v13  ;;  %v248_v41 = vld [vmem:[%s2328_s3 + $0x148] sm:$0xff]  ;;  %v1073_v42 = vpack.c.bf16 %v259_v36, %v256_v35  ;;  %v262_v45 = vld [vmem:[%s2328_s3 + $0x1b8] sm:$0xff]  ;;  %v265_v46 = vld [vmem:[%s2328_s3 + $0x1d0] sm:$0xff]  ;;  %v1075_v48 = vpack.c.bf16 %v258_v44, %v255_v43 }
  0x1a   :  { %1056 = vmatpush1.bf16.msra.mxu0 %v1055_v52  ;;  %1186 = vmatprep.subr.bf16.mxu1 %v1185_v16  ;;  %v1195_v47 = vpack.c.bf16 %v248_v41, %v245_v40  ;;  %v1077_v49 = vpack.c.bf16 %v265_v46, %v262_v45  ;;  %v261_v50 = vld [vmem:[%s2328_s3 + $0x1b0] sm:$0xff]  ;;  %v264_v51 = vld [vmem:[%s2328_s3 + $0x1c8] sm:$0xff]  ;;  %v271_v53 = vld [vmem:[%s2328_s3 + $0x200] sm:$0xff] }
  0x1b   :  { %1058 = vmatprep.subr.bf16.mxu0 %v1057_v56  ;;  %v268_v52 = vld [vmem:[%s2328_s3 + $0x1e8] sm:$0xff]  ;;  %v1079_v54 = vpack.c.bf16 %v264_v51, %v261_v50  ;;  %v267_v56 = vld [vmem:[%s2328_s3 + $0x1e0] sm:$0xff]  ;;  %v270_v57 = vld [vmem:[%s2328_s3 + $0x1f8] sm:$0xff] }
  0x1c   :  { %v1081_v55 = vpack.c.bf16 %v271_v53, %v268_v52  ;;  %v274_v58 = vld [vmem:[%s2328_s3 + $0x218] sm:$0xff]  ;;  %v277_v59 = vld [vmem:[%s2328_s3 + $0x230] sm:$0xff]  ;;  %v1083_v60 = vpack.c.bf16 %v270_v57, %v267_v56  ;;  %v276_v63 = vld [vmem:[%s2328_s3 + $0x228] sm:$0xff] }
  0x1d   :  { %1188 = vmatpush3.bf16.msra.mxu1 %v1187_v25  ;;  %v1085_v61 = vpack.c.bf16 %v277_v59, %v274_v58  ;;  %v273_v62 = vld [vmem:[%s2328_s3 + $0x210] sm:$0xff]  ;;  %v280_v0 = vld [vmem:[%s2328_s3 + $0x248] sm:$0xff]  ;;  %v279_v5 = vld [vmem:[%s2328_s3 + $0x240] sm:$0xff] }
  0x1e   :  { %1060 = vmatpush1.bf16.msra.mxu0 %v1059_v1  ;;  %1190 = vmatprep.subr.bf16.mxu1 %v1189_v28  ;;  %v283_v1 = vld [vmem:[%s2328_s3 + $0x260] sm:$0xff]  ;;  %v1087_v2 = vpack.c.bf16 %v276_v63, %v273_v62  ;;  %v282_v6 = vld [vmem:[%s2328_s3 + $0x258] sm:$0xff]  ;;  %v289_v8 = vld [vmem:[%s2328_s3 + $0x290] sm:$0xff] }
  0x1f   :  { %1062 = vmatprep.subr.bf16.mxu0 %v1061_v7  ;;  %v1089_v4 = vpack.c.bf16 %v283_v1, %v280_v0  ;;  %v286_v7 = vld [vmem:[%s2328_s3 + $0x278] sm:$0xff]  ;;  %v1091_v9 = vpack.c.bf16 %v282_v6, %v279_v5  ;;  %v285_v11 = vld [vmem:[%s2328_s3 + $0x270] sm:$0xff]  ;;  %v288_v12 = vld [vmem:[%s2328_s3 + $0x288] sm:$0xff] }
  0x20   :  { %v1093_v10 = vpack.c.bf16 %v289_v8, %v286_v7  ;;  %v292_v13 = vld [vmem:[%s2328_s3 + $0x2a8] sm:$0xff]  ;;  %v1095_v15 = vpack.c.bf16 %v288_v12, %v285_v11  ;;  %v291_v17 = vld [vmem:[%s2328_s3 + $0x2a0] sm:$0xff]  ;;  %v294_v18 = vld [vmem:[%s2328_s3 + $0x2b8] sm:$0xff] }
  0x21   :  { %1192 = vmatpush3.bf16.msra.mxu1 %v1191_v37  ;;  %v298_v20 = vld [vmem:[%s2328_s3 + $0x2d8] sm:$0xff]  ;;  %v301_v21 = vld [vmem:[%s2328_s3 + $0x2f0] sm:$0xff]  ;;  %v299_v22 = vld [vmem:[%s2328_s3 + $0x2e0] sm:$0xff] }
  0x22   :  { %1064 = vmatpush1.bf16.msra.mxu0 %v1063_v14  ;;  %1194 = vmatprep.subr.bf16.mxu1 %v1193_v39  ;;  %v295_v14 = vld [vmem:[%s2328_s3 + $0x2c0] sm:$0xff]  ;;  %v1101_v23 = vpack.c.bf16 %v301_v21, %v298_v20  ;;  %v302_v24 = vld [vmem:[%s2328_s3 + $0x2f8] sm:$0xff]  ;;  %v297_v25 = vld [vmem:[%s2328_s3 + $0x2d0] sm:$0xff] }
  0x23   :  { %1066 = vmatprep.subr.bf16.mxu0 %v1065_v19  ;;  %v1097_v16 = vpack.c.bf16 %v295_v14, %v292_v13  ;;  %v1099_v19 = vpack.c.bf16 %v294_v18, %v291_v17  ;;  %v1197_v27 = vpack.c.bf16 %v302_v24, %v299_v22  ;;  %v251_v29 = vld [vmem:[%s2328_s3 + $0x160] sm:$0xff]  ;;  %v254_v30 = vld [vmem:[%s2328_s3 + $0x178] sm:$0xff]  ;;  %v304_v32 = vld [vmem:[%s2328_s3 + $0x308] sm:$0xff] }
  0x24   :  { %v307_v33 = vld [vmem:[%s2328_s3 + $0x320] sm:$0xff]  ;;  %v353_v34 = vld [vmem:[%s2328_s3 + $0x490] sm:$0xff]  ;;  %v356_v36 = vld [vmem:[%s2328_s3 + $0x4a8] sm:$0xff] }
  0x25   :  { %1196 = vmatpush3.bf16.msra.mxu1 %v1195_v47  ;;  %v1105_v35 = vpack.c.bf16 %v307_v33, %v304_v32  ;;  %v1201_v37 = vpack.c.bf16 %v356_v36, %v353_v34  ;;  %v1720_v41 = vld [vmem:[%s2330_s2] sm:$0xf]  ;;  %v305_v51 = vld [vmem:[%s2328_s3 + $0x310] sm:$0xff]  ;;  %v308_v52 = vld [vmem:[%s2328_s3 + $0x328] sm:$0xff] }
  0x26   :  { %1068 = vmatpush1.bf16.msra.mxu0 %v1067_v26  ;;  %v300_v26 = vld [vmem:[%s2328_s3 + $0x2e8] sm:$0xff]  ;;  %1198 = vmatprep.subr.bf16.mxu1 %v1197_v27  ;;  %v303_v47 = vld [vmem:[%s2328_s3 + $0x300] sm:$0xff]  ;;  %v310_v53 = vld [vmem:[%s2328_s3 + $0x338] sm:$0xff] }
  0x27   :  { %1070 = vmatprep.subr.bf16.mxu0 %v1069_v31  ;;  %v1103_v28 = vpack.c.bf16 %v300_v26, %v297_v25  ;;  %v1199_v31 = vpack.c.bf16 %v254_v30, %v251_v29  ;;  %v359_v56 = vld [vmem:[%s2328_s3 + $0x4c0] sm:$0xff]  ;;  %v362_v57 = vld [vmem:[%s2328_s3 + $0x4d8] sm:$0xff]  ;;  %v309_v62 = vld [vmem:[%s2328_s3 + $0x330] sm:$0xff] }
  0x28   :  { %v312_v63 = vld [vmem:[%s2328_s3 + $0x348] sm:$0xff]  ;;  %v311_v5 = vld [vmem:[%s2328_s3 + $0x340] sm:$0xff]  ;;  %v314_v6 = vld [vmem:[%s2328_s3 + $0x358] sm:$0xff] }
  0x29   :  { %1200 = vmatpush3.bf16.msra.mxu1 %v1199_v31  ;;  %v316_v7 = vld [vmem:[%s2328_s3 + $0x368] sm:$0xff]  ;;  %v1111_v13 = vpack.c.bf16 %v312_v63, %v309_v62  ;;  %v1207_v14 = vpack.c.bf16 %v314_v6, %v311_v5  ;;  %v317_v20 = vld [vmem:[%s2328_s3 + $0x370] sm:$0xff]  ;;  %v322_v22 = vld [vmem:[%s2328_s3 + $0x398] sm:$0xff] }
  0x2a   :  { %1072 = vmatpush1.bf16.msra.mxu0 %v1071_v38  ;;  %1202 = vmatprep.subr.bf16.mxu1 %v1201_v37  ;;  %v37_v38 = vlaneseq  ;;  %v368_v11 = vld [vmem:[%s2328_s3 + $0x508] sm:$0xff]  ;;  %v371_v24 = vld [vmem:[%s2328_s3 + $0x520] sm:$0xff]  ;;  %v374_v25 = vld [vmem:[%s2328_s3 + $0x538] sm:$0xff] }
  0x2b   :  { %1074 = vmatprep.subr.bf16.mxu0 %v1073_v42  ;;  %v320_v21 = vld [vmem:[%s2328_s3 + $0x388] sm:$0xff]  ;;  %v1213_v31 = vpack.c.bf16 %v374_v25, %v371_v24  ;;  %v323_v32 = vld [vmem:[%s2328_s3 + $0x3a0] sm:$0xff]  ;;  %v326_v33 = vld [vmem:[%s2328_s3 + $0x3b8] sm:$0xff] }
  0x2c   :  { %v1712_v39 = vshrl.u32 %v37_v38, 7  ;;  %v1211_v27 = vpack.c.bf16 %v320_v21, %v317_v20  ;;  %v324_v29 = vld [vmem:[%s2328_s3 + $0x3a8] sm:$0xff]  ;;  %v377_v36 = vld [vmem:[%s2328_s3 + $0x550] sm:$0xff]  ;;  %v343_v63 = vld [vmem:[%s2328_s3 + $0x440] sm:$0xff] }
  0x2d   :  { %v328_v34 = vld [vmem:[%s2328_s3 + $0x3c8] sm:$0xff]  ;;  %v345_v20 = vld [vmem:[%s2328_s3 + $0x450] sm:$0xff]  ;;  %v350_v24 = vld [vmem:[%s2328_s3 + $0x478] sm:$0xff] }
  0x2e   :  { %1076 = vmatpush1.bf16.msra.mxu0 %v1075_v48  ;;  %v1715_v40 = vsub.s32 0, %v1712_v39  ;;  %v1723_v42 = vsub.s32 1, %v1712_v39  ;;  %v51_v45 = vsub.s32 3, %v1712_v39  ;;  %v306_v48 = vld [vmem:[%s2328_s3 + $0x318] sm:$0xff]  ;;  %v380_v37 = vld [vmem:[%s2328_s3 + $0x568] sm:$0xff] }
  0x2f   :  { %1078 = vmatprep.subr.bf16.mxu0 %v1077_v49  ;;  %v340_v62 = vld [vmem:[%s2328_s3 + $0x428] sm:$0xff] }
  0x30   :  { %v40_v43 = vrot.slane %v1720_v41, %v1715_v40  ;;  %v44_v44 = vrot.slane %v1720_v41, %v1723_v42  ;;  %v52_v58 = vrot.slane %v1720_v41, %v51_v45  ;;  %v330_v45 = vld [vmem:[%s2328_s3 + $0x3d8] sm:$0xff]  ;;  %v352_v25 = vld [vmem:[%s2328_s3 + $0x488] sm:$0xff] }
  0x32   :  { %1080 = vmatpush1.bf16.msra.mxu0 %v1079_v54 }
  0x33   :  { %1082 = vmatprep.subr.bf16.mxu0 %v1081_v55  ;;  %v313_v55 = vld [vmem:[%s2328_s3 + $0x350] sm:$0xff] }
  0x36   :  { %1084 = vmatpush1.bf16.msra.mxu0 %v1083_v60  ;;  %v1107_v60 = vpack.c.bf16 %v306_v48, %v303_v47  ;;  %v1217_v47 = vpack.c.bf16 %v380_v37, %v377_v36  ;;  %v329_v48 = vld [vmem:[%s2328_s3 + $0x3d0] sm:$0xff] }
  0x37   :  { %1086 = vmatprep.subr.bf16.mxu0 %v1085_v61  ;;  %v1203_v61 = vpack.c.bf16 %v308_v52, %v305_v51  ;;  %v337_v51 = vld [vmem:[%s2328_s3 + $0x410] sm:$0xff]  ;;  %v383_v52 = vld [vmem:[%s2328_s3 + $0x580] sm:$0xff] }
  0x38   :  { %v357_v37 = vld [vmem:[%s2328_s3 + $0x4b0] sm:$0xff] }
  0x3a   :  { %1088 = vmatpush1.bf16.msra.mxu0 %v1087_v2  ;;  %v1109_v2 = vpack.c.bf16 %v313_v55, %v310_v53  ;;  %v386_v53 = vld [vmem:[%s2328_s3 + $0x598] sm:$0xff] }
  0x3b   :  { %1090 = vmatprep.subr.bf16.mxu0 %v1089_v4  ;;  %v1205_v4 = vpack.c.bf16 %v362_v57, %v359_v56  ;;  %v333_v56 = vld [vmem:[%s2328_s3 + $0x3f0] sm:$0xff]  ;;  %v336_v57 = vld [vmem:[%s2328_s3 + $0x408] sm:$0xff] }
  0x3c   :  { %v1127_v5 = vpack.c.bf16 %v336_v57, %v333_v56  ;;  %v379_v56 = vld [vmem:[%s2328_s3 + $0x560] sm:$0xff] }
  0x3e   :  { %1092 = vmatpush1.bf16.msra.mxu0 %v1091_v9  ;;  %v319_v9 = vld [vmem:[%s2328_s3 + $0x380] sm:$0xff] }
  0x3f   :  { %1094 = vmatprep.subr.bf16.mxu0 %v1093_v10  ;;  %v365_v10 = vld [vmem:[%s2328_s3 + $0x4f0] sm:$0xff]  ;;  %v1113_v18 = vpack.c.bf16 %v319_v9, %v316_v7  ;;  %v339_v7 = vld [vmem:[%s2328_s3 + $0x420] sm:$0xff]  ;;  %v1129_v9 = vpack.c.bf16 %v343_v63, %v340_v62 }
  0x40   :  { %v385_v62 = vld [vmem:[%s2328_s3 + $0x590] sm:$0xff] }
  0x42   :  { %1096 = vmatpush1.bf16.msra.mxu0 %v1095_v15  ;;  %v315_v15 = vld [vmem:[%s2328_s3 + $0x360] sm:$0xff] }
  0x43   :  { %1098 = vmatprep.subr.bf16.mxu0 %v1097_v16  ;;  %v318_v16 = vld [vmem:[%s2328_s3 + $0x378] sm:$0xff] }
  0x44   :  { %v1115_v26 = vpack.c.bf16 %v318_v16, %v315_v15  ;;  %v395_v15 = vld [vmem:[%s2328_s3 + $0x5e0] sm:$0xff]  ;;  %v398_v16 = vld [vmem:[%s2328_s3 + $0x5f8] sm:$0xff] }
  0x46   :  { %1100 = vmatpush1.bf16.msra.mxu0 %v1099_v19  ;;  %v1209_v19 = vpack.c.bf16 %v368_v11, %v365_v10  ;;  %v341_v11 = vld [vmem:[%s2328_s3 + $0x430] sm:$0xff] }
  0x47   :  { %1102 = vmatprep.subr.bf16.mxu0 %v1101_v23  ;;  %v325_v23 = vld [vmem:[%s2328_s3 + $0x3b0] sm:$0xff] }
  0x48   :  { %v1117_v30 = vpack.c.bf16 %v325_v23, %v322_v22  ;;  %v1229_v22 = vpack.c.bf16 %v398_v16, %v395_v15  ;;  %v348_v23 = vld [vmem:[%s2328_s3 + $0x468] sm:$0xff]  ;;  %v393_v16 = vld [vmem:[%s2328_s3 + $0x5d0] sm:$0xff] }
  0x4a   :  { %1104 = vmatpush1.bf16.msra.mxu0 %v1103_v28  ;;  %v321_v28 = vld [vmem:[%s2328_s3 + $0x390] sm:$0xff] }
  0x4b   :  { %1106 = vmatprep.subr.bf16.mxu0 %v1105_v35  ;;  %v331_v35 = vld [vmem:[%s2328_s3 + $0x3e0] sm:$0xff]  ;;  %v1119_v38 = vpack.c.bf16 %v324_v29, %v321_v28  ;;  %v1135_v28 = vpack.c.bf16 %v348_v23, %v345_v20  ;;  %v704_v20 = vld [vmem:[%s2331_s5 + $0x18] sm:$0xff]  ;;  %v703_v23 = vld [vmem:[%s2331_s5 + $0x10] sm:$0xff] }
  0xdc   :  { %v127_v46 = vpop.f32.mrb[0].mxu0 }
  0xdd   :  { %v128_v49 = vadd.f32 %v127_v46, %v40_v43  ;;  %v129_v50 = vpop.f32.mrb[1].mxu0  ;;  %v1215_v43 = vpack.c.bf16 %v326_v33, %v323_v32  ;;  %v1121_v46 = vpack.c.bf16 %v331_v35, %v328_v34  ;;  %v354_v32 = vld [vmem:[%s2328_s3 + $0x498] sm:$0xff]  ;;  %v361_v33 = vld [vmem:[%s2328_s3 + $0x4d0] sm:$0xff] }
  0xde   :  { %v130_v54 = vadd.f32 %v129_v50, %v44_v44  ;;  %v327_v44 = vld [vmem:[%s2328_s3 + $0x3c0] sm:$0xff]  ;;  %v334_v50 = vld [vmem:[%s2328_s3 + $0x3f8] sm:$0xff] }
  0xdf   :  { %v203_v1 = vmax.f32 %v128_v49, 0.0  ;;  %v332_v49 = vld [vmem:[%s2328_s3 + $0x3e8] sm:$0xff] }
  0xe0   :  { %v204_v59 = vmax.f32 %v130_v54, 0.0  ;;  %v1761_v0 = vpop.f32.mrb[2].mxu0  ;;  %v1123_v54 = vpack.c.bf16 %v330_v45, %v327_v44  ;;  %v1219_v55 = vpack.c.bf16 %v332_v49, %v329_v48  ;;  %v367_v44 = vld [vmem:[%s2328_s3 + $0x500] sm:$0xff]  ;;  %v366_v48 = vld [vmem:[%s2328_s3 + $0x4f8] sm:$0xff] }
  0xe1   :  { %v200_v8 = vpop.f32.mrb[3].mxu0  ;;  %v370_v49 = vld [vmem:[%s2328_s3 + $0x518] sm:$0xff] }
  0xe2   :  { %480 = vmatprep.mubr.f32.mxu0 %v204_v59  ;;  %622 = vmatprep.mubr.f32.mxu1 %v204_v59  ;;  %v201_v12 = vadd.f32 %v200_v8, %v52_v58  ;;  %v1125_v58 = vpack.c.bf16 %v337_v51, %v334_v50  ;;  %v1221_v59 = vpack.c.bf16 %v386_v53, %v383_v52  ;;  %v342_v8 = vld [vmem:[%s2328_s3 + $0x438] sm:$0xff]  ;;  %v373_v50 = vld [vmem:[%s2328_s3 + $0x530] sm:$0xff] }
  0xe3   :  { %481 = vmatmul.mubr.f32.vlgmr.msra.gmra.mrb[4].mxu0 %v203_v1  ;;  %623 = vmatmul.mubr.f32.vlgmr.msra.gmra.mrb[0].mxu1 %v203_v1  ;;  %v389_v1 = vld [vmem:[%s2328_s3 + $0x5b0] sm:$0xff]  ;;  %v1149_v52 = vpack.c.bf16 %v373_v50, %v370_v49  ;;  %v722_v50 = vld [vmem:[%s2331_s5 + $0xa8] sm:$0xff] }
  0xe4   :  { %1108 = vmatpush1.bf16.msra.mxu0 %v1107_v60  ;;  %1204 = vmatpush3.bf16.msra.mxu1 %v1203_v61  ;;  %v206_v17 = vmax.f32 %v201_v12, 0.0  ;;  %v335_v60 = vld [vmem:[%s2328_s3 + $0x400] sm:$0xff]  ;;  %v338_v61 = vld [vmem:[%s2328_s3 + $0x418] sm:$0xff]  ;;  %v344_v12 = vld [vmem:[%s2328_s3 + $0x448] sm:$0xff] }
  0xe5   :  { %1110 = vmatprep.subr.bf16.mxu0 %v1109_v2  ;;  %1206 = vmatprep.subr.bf16.mxu1 %v1205_v4  ;;  %v392_v2 = vld [vmem:[%s2328_s3 + $0x5c8] sm:$0xff]  ;;  %v47_v4 = vsub.s32 2, %v1712_v39  ;;  %v1223_v6 = vpack.c.bf16 %v338_v61, %v335_v60  ;;  %v369_v53 = vld [vmem:[%s2328_s3 + $0x510] sm:$0xff]  ;;  %v378_v60 = vld [vmem:[%s2328_s3 + $0x558] sm:$0xff] }
  0xe6   :  { %692 = vmatprep.mubr.f32.mxu1 %v206_v17  ;;  %551 = vmatprep.mubr.f32.mxu0 %v206_v17  ;;  %v1225_v10 = vpack.c.bf16 %v392_v2, %v389_v1  ;;  %v382_v61 = vld [vmem:[%s2328_s3 + $0x578] sm:$0xff]  ;;  %v381_v2 = vld [vmem:[%s2328_s3 + $0x570] sm:$0xff] }
  0xe7   :  { %v48_v17 = vrot.slane %v1720_v41, %v47_v4  ;;  %v347_v41 = vld [vmem:[%s2328_s3 + $0x460] sm:$0xff]  ;;  %v1157_v1 = vpack.c.bf16 %v385_v62, %v382_v61  ;;  %v719_v49 = vld [vmem:[%s2331_s5 + $0x90] sm:$0xff] }
  0xe8   :  { %1112 = vmatpush1.bf16.msra.mxu0 %v1111_v13  ;;  %1208 = vmatpush3.bf16.msra.mxu1 %v1207_v14  ;;  %v346_v13 = vld [vmem:[%s2328_s3 + $0x458] sm:$0xff]  ;;  %v349_v14 = vld [vmem:[%s2328_s3 + $0x470] sm:$0xff]  ;;  %v1231_v29 = vpack.c.bf16 %v350_v24, %v347_v41  ;;  %v706_v41 = vld [vmem:[%s2331_s5 + $0x28] sm:$0xff] }
  0xe9   :  { %1114 = vmatprep.subr.bf16.mxu0 %v1113_v18  ;;  %1210 = vmatprep.subr.bf16.mxu1 %v1209_v19  ;;  %v1131_v18 = vpack.c.bf16 %v342_v8, %v339_v7  ;;  %v1227_v19 = vpack.c.bf16 %v344_v12, %v341_v11  ;;  %v1133_v21 = vpack.c.bf16 %v349_v14, %v346_v13  ;;  %v391_v7 = vld [vmem:[%s2328_s3 + $0x5c0] sm:$0xff]  ;;  %v390_v11 = vld [vmem:[%s2328_s3 + $0x5b8] sm:$0xff]  ;;  %v397_v13 = vld [vmem:[%s2328_s3 + $0x5f0] sm:$0xff] }
  0xea   :  { %v394_v12 = vld [vmem:[%s2328_s3 + $0x5d8] sm:$0xff]  ;;  %v727_v61 = vld [vmem:[%s2331_s5 + $0xd0] sm:$0xff] }
  0xeb   :  { %v1165_v15 = vpack.c.bf16 %v397_v13, %v394_v12  ;;  %v735_v12 = vld [vmem:[%s2331_s5 + $0x110] sm:$0xff] }
  0xec   :  { %1116 = vmatpush1.bf16.msra.mxu0 %v1115_v26  ;;  %1212 = vmatpush3.bf16.msra.mxu1 %v1211_v27  ;;  %v355_v26 = vld [vmem:[%s2328_s3 + $0x4a0] sm:$0xff]  ;;  %v1924_v27 = vadd.f32 %v1761_v0, %v48_v17  ;;  %v358_v0 = vld [vmem:[%s2328_s3 + $0x4b8] sm:$0xff]  ;;  %v396_v17 = vld [vmem:[%s2328_s3 + $0x5e8] sm:$0xff] }
  0xed   :  { %1118 = vmatprep.subr.bf16.mxu0 %v1117_v30  ;;  %1214 = vmatprep.subr.bf16.mxu1 %v1213_v31  ;;  %v1137_v30 = vpack.c.bf16 %v355_v26, %v352_v25  ;;  %v351_v31 = vld [vmem:[%s2328_s3 + $0x480] sm:$0xff]  ;;  %v1141_v36 = vpack.c.bf16 %v361_v33, %v358_v0  ;;  %v708_v25 = vld [vmem:[%s2331_s5 + $0x38] sm:$0xff]  ;;  %v711_v33 = vld [vmem:[%s2331_s5 + $0x50] sm:$0xff] }
  0xee   :  { %v205_v34 = vmax.f32 %v1924_v27, 0.0  ;;  %v1139_v35 = vpack.c.bf16 %v354_v32, %v351_v31  ;;  %v705_v26 = vld [vmem:[%s2331_s5 + $0x20] sm:$0xff]  ;;  %v707_v27 = vld [vmem:[%s2331_s5 + $0x30] sm:$0xff] }
  0xef   :  { %v1239_v31 = vpack.c.bf16 %v707_v27, %v705_v26  ;;  %v709_v0 = vld [vmem:[%s2331_s5 + $0x40] sm:$0xff]  ;;  %v767_v39 = vld [vmem:[%s2331_s5 + $0x210] sm:$0xff] }
  0xf0   :  { %1120 = vmatpush1.bf16.msra.mxu0 %v1119_v38  ;;  %1216 = vmatpush3.bf16.msra.mxu1 %v1215_v43  ;;  %v360_v38 = vld [vmem:[%s2328_s3 + $0x4c8] sm:$0xff] }
  0xf1   :  { %1122 = vmatprep.subr.bf16.mxu0 %v1121_v46  ;;  %1218 = vmatprep.subr.bf16.mxu1 %v1217_v47  ;;  %v364_v43 = vld [vmem:[%s2328_s3 + $0x4e8] sm:$0xff]  ;;  %v1143_v45 = vpack.c.bf16 %v360_v38, %v357_v37  ;;  %v363_v47 = vld [vmem:[%s2328_s3 + $0x4e0] sm:$0xff] }
  0xf2   :  { %v1145_v46 = vpack.c.bf16 %v367_v44, %v364_v43  ;;  %v1147_v51 = vpack.c.bf16 %v366_v48, %v363_v47  ;;  %v713_v38 = vld [vmem:[%s2331_s5 + $0x60] sm:$0xff]  ;;  %v715_v43 = vld [vmem:[%s2331_s5 + $0x70] sm:$0xff]  ;;  %v718_v44 = vld [vmem:[%s2331_s5 + $0x88] sm:$0xff] }
  0xf3   :  { %v717_v48 = vld [vmem:[%s2331_s5 + $0x80] sm:$0xff] }
  0xf4   :  { %1124 = vmatpush1.bf16.msra.mxu0 %v1123_v54  ;;  %1220 = vmatpush3.bf16.msra.mxu1 %v1219_v55  ;;  %v372_v54 = vld [vmem:[%s2328_s3 + $0x528] sm:$0xff] }
  0xf5   :  { %1126 = vmatprep.subr.bf16.mxu0 %v1125_v58  ;;  %1222 = vmatprep.subr.bf16.mxu1 %v1221_v59  ;;  %v376_v55 = vld [vmem:[%s2328_s3 + $0x548] sm:$0xff]  ;;  %v1151_v57 = vpack.c.bf16 %v372_v54, %v369_v53  ;;  %v375_v59 = vld [vmem:[%s2328_s3 + $0x540] sm:$0xff] }
  0xf6   :  { %v1153_v58 = vpack.c.bf16 %v379_v56, %v376_v55  ;;  %v1155_v63 = vpack.c.bf16 %v378_v60, %v375_v59  ;;  %v721_v54 = vld [vmem:[%s2331_s5 + $0xa0] sm:$0xff]  ;;  %v723_v55 = vld [vmem:[%s2331_s5 + $0xb0] sm:$0xff]  ;;  %v726_v56 = vld [vmem:[%s2331_s5 + $0xc8] sm:$0xff] }
  0xf7   :  { %v725_v60 = vld [vmem:[%s2331_s5 + $0xc0] sm:$0xff] }
  0xf8   :  { %1128 = vmatpush1.bf16.msra.mxu0 %v1127_v5  ;;  %1224 = vmatpush3.bf16.msra.mxu1 %v1223_v6  ;;  %v384_v5 = vld [vmem:[%s2328_s3 + $0x588] sm:$0xff]  ;;  %v1259_v62 = vpack.c.bf16 %v727_v61, %v725_v60 }
  0xf9   :  { %1130 = vmatprep.subr.bf16.mxu0 %v1129_v9  ;;  %1226 = vmatprep.subr.bf16.mxu1 %v1225_v10  ;;  %v388_v6 = vld [vmem:[%s2328_s3 + $0x5a8] sm:$0xff]  ;;  %v1159_v8 = vpack.c.bf16 %v384_v5, %v381_v2  ;;  %v387_v10 = vld [vmem:[%s2328_s3 + $0x5a0] sm:$0xff] }
  0xfa   :  { %v1161_v9 = vpack.c.bf16 %v391_v7, %v388_v6  ;;  %v1163_v14 = vpack.c.bf16 %v390_v11, %v387_v10  ;;  %v729_v5 = vld [vmem:[%s2331_s5 + $0xe0] sm:$0xff]  ;;  %v731_v6 = vld [vmem:[%s2331_s5 + $0xf0] sm:$0xff] }
  0xfb   :  { %v1263_v7 = vpack.c.bf16 %v731_v6, %v729_v5  ;;  %v733_v11 = vld [vmem:[%s2331_s5 + $0x100] sm:$0xff] }
  0xfc   :  { %1132 = vmatpush1.bf16.msra.mxu0 %v1131_v18  ;;  %1228 = vmatpush3.bf16.msra.mxu1 %v1227_v19  ;;  %v1167_v18 = vpack.c.bf16 %v396_v17, %v393_v16  ;;  %v702_v19 = vld [vmem:[%s2331_s5 + $0x8] sm:$0xff]  ;;  %v1267_v13 = vpack.c.bf16 %v735_v12, %v733_v11  ;;  %v737_v16 = vld [vmem:[%s2331_s5 + $0x120] sm:$0xff] }
  0xfd   :  { %1134 = vmatprep.subr.bf16.mxu0 %v1133_v21  ;;  %1230 = vmatprep.subr.bf16.mxu1 %v1229_v22  ;;  %v1233_v21 = vpack.c.bf16 %v704_v20, %v702_v19  ;;  %v701_v22 = vld [vmem:[%s2331_s5] sm:$0xff]  ;;  %v742_v19 = vld [vmem:[%s2331_s5 + $0x148] sm:$0xff]  ;;  %v744_v20 = vld [vmem:[%s2331_s5 + $0x158] sm:$0xff] }
  0xfe   :  { %v1235_v24 = vpack.c.bf16 %v703_v23, %v701_v22  ;;  %v1273_v22 = vpack.c.bf16 %v744_v20, %v742_v19  ;;  %v741_v23 = vld [vmem:[%s2331_s5 + $0x140] sm:$0xff] }
 0x100   :  { %1136 = vmatpush1.bf16.msra.mxu0 %v1135_v28  ;;  %1232 = vmatpush3.bf16.msra.mxu1 %v1231_v29  ;;  %v1237_v28 = vpack.c.bf16 %v708_v25, %v706_v41  ;;  %v710_v29 = vld [vmem:[%s2331_s5 + $0x48] sm:$0xff]  ;;  %v743_v41 = vld [vmem:[%s2331_s5 + $0x150] sm:$0xff]  ;;  %v748_v25 = vld [vmem:[%s2331_s5 + $0x178] sm:$0xff] }
 0x101   :  { %1138 = vmatprep.subr.bf16.mxu0 %v1137_v30  ;;  %1234 = vmatprep.subr.bf16.mxu1 %v1233_v21  ;;  %v712_v30 = vld [vmem:[%s2331_s5 + $0x58] sm:$0xff]  ;;  %v1275_v26 = vpack.c.bf16 %v743_v41, %v741_v23  ;;  %v771_v23 = vld [vmem:[%s2331_s5 + $0x230] sm:$0xff]  ;;  %v774_v41 = vld [vmem:[%s2331_s5 + $0x248] sm:$0xff] }
 0x102   :  { %v1241_v32 = vpack.c.bf16 %v712_v30, %v710_v29  ;;  %v747_v29 = vld [vmem:[%s2331_s5 + $0x170] sm:$0xff]  ;;  %v750_v30 = vld [vmem:[%s2331_s5 + $0x188] sm:$0xff] }
 0x103   :  { %693 = vmatmul.mubr.f32.vlgmr.msra.gmra.mrb[2].mxu1 %v205_v34 }
 0x104   :  { %1140 = vmatpush1.bf16.msra.mxu0 %v1139_v35  ;;  %1236 = vmatpush1.bf16.msra.mxu1 %v1235_v24  ;;  %v716_v35 = vld [vmem:[%s2331_s5 + $0x78] sm:$0xff]  ;;  %v746_v24 = vld [vmem:[%s2331_s5 + $0x168] sm:$0xff] }
 0x105   :  { %1142 = vmatprep.subr.bf16.mxu0 %v1141_v36  ;;  %1238 = vmatprep.subr.bf16.mxu1 %v1237_v28  ;;  %v1243_v36 = vpack.c.bf16 %v711_v33, %v709_v0  ;;  %v1277_v27 = vpack.c.bf16 %v748_v25, %v746_v24  ;;  %v745_v28 = vld [vmem:[%s2331_s5 + $0x160] sm:$0xff]  ;;  %v776_v24 = vld [vmem:[%s2331_s5 + $0x258] sm:$0xff] }
 0x106   :  { %v749_v33 = vld [vmem:[%s2331_s5 + $0x180] sm:$0xff] }
 0x108   :  { %1144 = vmatpush1.bf16.msra.mxu0 %v1143_v45  ;;  %1240 = vmatpush1.bf16.msra.mxu1 %v1239_v31  ;;  %v720_v45 = vld [vmem:[%s2331_s5 + $0x98] sm:$0xff] }
 0x109   :  { %1146 = vmatprep.subr.bf16.mxu0 %v1145_v46  ;;  %1242 = vmatprep.subr.bf16.mxu1 %v1241_v32  ;;  %v1247_v46 = vpack.c.bf16 %v715_v43, %v713_v38  ;;  %v1249_v47 = vpack.c.bf16 %v720_v45, %v718_v44  ;;  %v752_v31 = vld [vmem:[%s2331_s5 + $0x198] sm:$0xff]  ;;  %v1279_v32 = vpack.c.bf16 %v747_v29, %v745_v28  ;;  %v753_v43 = vld [vmem:[%s2331_s5 + $0x1a0] sm:$0xff]  ;;  %v755_v44 = vld [vmem:[%s2331_s5 + $0x1b0] sm:$0xff] }
 0x10a   :  { %v1281_v0 = vpack.c.bf16 %v752_v31, %v750_v30  ;;  %v758_v45 = vld [vmem:[%s2331_s5 + $0x1c8] sm:$0xff]  ;;  %v775_v28 = vld [vmem:[%s2331_s5 + $0x250] sm:$0xff]  ;;  %v780_v30 = vld [vmem:[%s2331_s5 + $0x278] sm:$0xff] }
 0x10b   :  { %v778_v29 = vld [vmem:[%s2331_s5 + $0x268] sm:$0xff] }
 0x10c   :  { %1148 = vmatpush1.bf16.msra.mxu0 %v1147_v51  ;;  %1244 = vmatpush1.bf16.msra.mxu1 %v1243_v36  ;;  %v724_v51 = vld [vmem:[%s2331_s5 + $0xb8] sm:$0xff]  ;;  %v1309_v31 = vpack.c.bf16 %v780_v30, %v778_v29 }
 0x10d   :  { %1150 = vmatprep.subr.bf16.mxu0 %v1149_v52  ;;  %v1251_v52 = vpack.c.bf16 %v719_v49, %v717_v48  ;;  %v1253_v53 = vpack.c.bf16 %v724_v51, %v722_v50  ;;  %v756_v36 = vld [vmem:[%s2331_s5 + $0x1b8] sm:$0xff]  ;;  %v757_v49 = vld [vmem:[%s2331_s5 + $0x1c0] sm:$0xff]  ;;  %v759_v50 = vld [vmem:[%s2331_s5 + $0x1d0] sm:$0xff] }
 0x10e   :  { %v1291_v51 = vpack.c.bf16 %v759_v50, %v757_v49  ;;  %v790_v49 = vld [vmem:[%s2331_s5 + $0x2c8] sm:$0xff]  ;;  %v792_v50 = vld [vmem:[%s2331_s5 + $0x2d8] sm:$0xff] }
 0x110   :  { %1152 = vmatpush1.bf16.msra.mxu0 %v1151_v57  ;;  %v728_v57 = vld [vmem:[%s2331_s5 + $0xd8] sm:$0xff] }
 0x111   :  { %1154 = vmatprep.subr.bf16.mxu0 %v1153_v58  ;;  %v1255_v58 = vpack.c.bf16 %v723_v55, %v721_v54  ;;  %v1257_v59 = vpack.c.bf16 %v728_v57, %v726_v56  ;;  %v761_v55 = vld [vmem:[%s2331_s5 + $0x1e0] sm:$0xff]  ;;  %v763_v56 = vld [vmem:[%s2331_s5 + $0x1f0] sm:$0xff] }
 0x112   :  { %v1295_v57 = vpack.c.bf16 %v763_v56, %v761_v55  ;;  %v794_v55 = vld [vmem:[%s2331_s5 + $0x2e8] sm:$0xff]  ;;  %v796_v56 = vld [vmem:[%s2331_s5 + $0x2f8] sm:$0xff] }
 0x114   :  { %1156 = vmatpush1.bf16.msra.mxu0 %v1155_v63  ;;  %v730_v63 = vld [vmem:[%s2331_s5 + $0xe8] sm:$0xff] }
 0x115   :  { %1158 = vmatprep.subr.bf16.mxu0 %v1157_v1  ;;  %v732_v1 = vld [vmem:[%s2331_s5 + $0xf8] sm:$0xff] }
 0x116   :  { %v1261_v2 = vpack.c.bf16 %v732_v1, %v730_v63  ;;  %v399_v1 = vld [vmem:[%s2332_s4] sm:$0x7] }
 0x117   :  { %v408_v11 = vrot.slane %v399_v1, %v1723_v42 }
 0x118   :  { %1160 = vmatpush1.bf16.msra.mxu0 %v1159_v8  ;;  %v734_v8 = vld [vmem:[%s2331_s5 + $0x108] sm:$0xff] }
 0x119   :  { %1162 = vmatprep.subr.bf16.mxu0 %v1161_v9  ;;  %v736_v9 = vld [vmem:[%s2331_s5 + $0x118] sm:$0xff] }
 0x11a   :  { %v1265_v10 = vpack.c.bf16 %v736_v9, %v734_v8 }
 0x11c   :  { %1164 = vmatpush1.bf16.msra.mxu0 %v1163_v14  ;;  %v738_v14 = vld [vmem:[%s2331_s5 + $0x128] sm:$0xff] }
 0x11d   :  { %1166 = vmatprep.subr.bf16.mxu0 %v1165_v15  ;;  %v740_v15 = vld [vmem:[%s2331_s5 + $0x138] sm:$0xff] }
 0x11e   :  { %v1269_v17 = vpack.c.bf16 %v740_v15, %v738_v14  ;;  %v765_v15 = vld [vmem:[%s2331_s5 + $0x200] sm:$0xff] }
 0x11f   :  { %v1299_v19 = vpack.c.bf16 %v767_v39, %v765_v15 }
 0x120   :  { %1168 = vmatpush1.bf16.msra.mxu0 %v1167_v18  ;;  %v739_v18 = vld [vmem:[%s2331_s5 + $0x130] sm:$0xff] }
 0x121   :  { %v1271_v21 = vpack.c.bf16 %v739_v18, %v737_v16  ;;  %v770_v16 = vld [vmem:[%s2331_s5 + $0x228] sm:$0xff] }
 0x123   :  { %552 = vmatmul.mubr.f32.vlgmr.msra.gmra.mrb[4].mxu0 %v205_v34  ;;  %v714_v34 = vld [vmem:[%s2331_s5 + $0x68] sm:$0xff] }
 0x124   :  { %v1245_v37 = vpack.c.bf16 %v716_v35, %v714_v34  ;;  %v751_v34 = vld [vmem:[%s2331_s5 + $0x190] sm:$0xff]  ;;  %v754_v35 = vld [vmem:[%s2331_s5 + $0x1a8] sm:$0xff] }
 0x125   :  { %v1285_v38 = vpack.c.bf16 %v756_v36, %v754_v35 }
 0x126   :  { %1246 = vmatprep.subr.bf16.mxu1 %v1245_v37  ;;  %v1283_v37 = vpack.c.bf16 %v751_v34, %v749_v33  ;;  %v782_v33 = vld [vmem:[%s2331_s5 + $0x288] sm:$0xff]  ;;  %v784_v34 = vld [vmem:[%s2331_s5 + $0x298] sm:$0xff] }
 0x127   :  { %1248 = vmatpush1.bf16.msra.mxu1 %v1247_v46  ;;  %v760_v46 = vld [vmem:[%s2331_s5 + $0x1d8] sm:$0xff]  ;;  %v1313_v36 = vpack.c.bf16 %v784_v34, %v782_v33 }
 0x128   :  { %1250 = vmatprep.subr.bf16.mxu1 %v1249_v47  ;;  %v1287_v47 = vpack.c.bf16 %v755_v44, %v753_v43  ;;  %v1289_v48 = vpack.c.bf16 %v760_v46, %v758_v45  ;;  %v786_v43 = vld [vmem:[%s2331_s5 + $0x2a8] sm:$0xff]  ;;  %v788_v44 = vld [vmem:[%s2331_s5 + $0x2b8] sm:$0xff] }
 0x129   :  { %v1317_v46 = vpack.c.bf16 %v788_v44, %v786_v43 }
 0x12b   :  { %1252 = vmatpush1.bf16.msra.mxu1 %v1251_v52  ;;  %v762_v52 = vld [vmem:[%s2331_s5 + $0x1e8] sm:$0xff] }
 0x12c   :  { %1254 = vmatprep.subr.bf16.mxu1 %v1253_v53  ;;  %v764_v53 = vld [vmem:[%s2331_s5 + $0x1f8] sm:$0xff] }
 0x12d   :  { %v1293_v54 = vpack.c.bf16 %v764_v53, %v762_v52  ;;  %v1321_v52 = vpack.c.bf16 %v792_v50, %v790_v49  ;;  %v789_v53 = vld [vmem:[%s2331_s5 + $0x2c0] sm:$0xff] }
 0x12f   :  { %1256 = vmatpush1.bf16.msra.mxu1 %v1255_v58  ;;  %v766_v58 = vld [vmem:[%s2331_s5 + $0x208] sm:$0xff] }
 0x130   :  { %1258 = vmatprep.subr.bf16.mxu1 %v1257_v59  ;;  %v768_v59 = vld [vmem:[%s2331_s5 + $0x218] sm:$0xff] }
 0x131   :  { %v1297_v60 = vpack.c.bf16 %v768_v59, %v766_v58  ;;  %v1325_v58 = vpack.c.bf16 %v796_v56, %v794_v55  ;;  %v793_v59 = vld [vmem:[%s2331_s5 + $0x2e0] sm:$0xff] }
 0x133   :  { %1260 = vmatpush1.bf16.msra.mxu1 %v1259_v62 }
 0x134   :  { %1262 = vmatprep.subr.bf16.mxu1 %v1261_v2  ;;  %v412_v2 = vrot.slane %v399_v1, %v47_v4 }
 0x137   :  { %1264 = vmatpush1.bf16.msra.mxu1 %v1263_v7 }
 0x138   :  { %1266 = vmatprep.subr.bf16.mxu1 %v1265_v10  ;;  %v404_v10 = vrot.slane %v399_v1, %v1715_v40 }
 0x13b   :  { %1268 = vmatpush1.bf16.msra.mxu1 %v1267_v13 }
 0x13c   :  { %1270 = vmatprep.subr.bf16.mxu1 %v1269_v17  ;;  %v772_v17 = vld [vmem:[%s2331_s5 + $0x238] sm:$0xff] }
 0x13f   :  { %1272 = vmatpush1.bf16.msra.mxu1 %v1271_v21  ;;  %v1301_v21 = vpack.c.bf16 %v772_v17, %v770_v16 }
 0x140   :  { %1274 = vmatprep.subr.bf16.mxu1 %v1273_v22  ;;  %v769_v22 = vld [vmem:[%s2331_s5 + $0x220] sm:$0xff] }
 0x141   :  { %v1303_v25 = vpack.c.bf16 %v771_v23, %v769_v22 }
 0x143   :  { %1276 = vmatpush1.bf16.msra.mxu1 %v1275_v26  ;;  %v1305_v26 = vpack.c.bf16 %v776_v24, %v774_v41 }
 0x144   :  { %1278 = vmatprep.subr.bf16.mxu1 %v1277_v27  ;;  %v773_v27 = vld [vmem:[%s2331_s5 + $0x240] sm:$0xff] }
 0x147   :  { %1280 = vmatpush1.bf16.msra.mxu1 %v1279_v32  ;;  %v777_v32 = vld [vmem:[%s2331_s5 + $0x260] sm:$0xff] }
 0x148   :  { %1282 = vmatprep.subr.bf16.mxu1 %v1281_v0  ;;  %v779_v0 = vld [vmem:[%s2331_s5 + $0x270] sm:$0xff] }
 0x149   :  { %v1311_v35 = vpack.c.bf16 %v779_v0, %v777_v32 }
 0x14b   :  { %1284 = vmatpush1.bf16.msra.mxu1 %v1283_v37  ;;  %v781_v37 = vld [vmem:[%s2331_s5 + $0x280] sm:$0xff] }
 0x14c   :  { %1286 = vmatprep.subr.bf16.mxu1 %v1285_v38  ;;  %v783_v38 = vld [vmem:[%s2331_s5 + $0x290] sm:$0xff] }
 0x14d   :  { %v1315_v45 = vpack.c.bf16 %v783_v38, %v781_v37 }
 0x14f   :  { %1288 = vmatpush1.bf16.msra.mxu1 %v1287_v47  ;;  %v785_v47 = vld [vmem:[%s2331_s5 + $0x2a0] sm:$0xff] }
 0x150   :  { %1290 = vmatprep.subr.bf16.mxu1 %v1289_v48  ;;  %v787_v48 = vld [vmem:[%s2331_s5 + $0x2b0] sm:$0xff] }
 0x153   :  { %1292 = vmatpush1.bf16.msra.mxu1 %v1291_v51  ;;  %v1319_v51 = vpack.c.bf16 %v787_v48, %v785_v47 }
 0x154   :  { %1294 = vmatprep.subr.bf16.mxu1 %v1293_v54  ;;  %v791_v54 = vld [vmem:[%s2331_s5 + $0x2d0] sm:$0xff] }
 0x157   :  { %1296 = vmatpush1.bf16.msra.mxu1 %v1295_v57  ;;  %v1323_v57 = vpack.c.bf16 %v791_v54, %v789_v53 }
 0x158   :  { %1298 = vmatprep.subr.bf16.mxu1 %v1297_v60  ;;  %v795_v60 = vld [vmem:[%s2331_s5 + $0x2f0] sm:$0xff] }
 0x1b6   :  { %v995_v61 = vpop.f32.mrb[0].mxu1 }
 0x1b7   :  { %v996_v62 = vpop.f32.mrb[1].mxu1 }
 0x1b8   :  { %v997_v63 = vadd.f32 %v996_v62, %v995_v61  ;;  %v1327_v61 = vpack.c.bf16 %v795_v60, %v793_v59 }
 0x1ba   :  { %v625_v7 = vadd.f32 %v997_v63, %v412_v2  ;;  %v797_v63 = vld [vmem:[%s2333_s6] sm:$0x3] }
 0x1bb   :  { %v802_v1 = vrot.slane %v797_v63, %v1715_v40  ;;  %v806_v2 = vrot.slane %v797_v63, %v1723_v42 }
 0x1d6   :  { %v1030_v5 = vpop.f32.mrb[2].mxu1 }
 0x1d7   :  { %v1031_v6 = vpop.f32.mrb[3].mxu1 }
 0x1d8   :  { %v1032_v8 = vadd.f32 %v1031_v6, %v1030_v5 }
 0x1da   :  { %v2220_v9 = vadd.f32 %v1032_v8, %v625_v7 }
 0x1dc   :  { %v700_v62 = vmax.f32 %v2220_v9, 0.0 }
 0x1f6   :  { %v553_v12 = vpop.f32.mrb[4].mxu0 }
 0x1f7   :  { %v1329_v13 = vadd.f32 %v553_v12, %v404_v10  ;;  %v555_v14 = vpop.f32.mrb[5].mxu0 }
 0x1f8   :  { %v1330_v4 = vadd.f32 %v555_v14, %v408_v11 }
 0x1f9   :  { %v698_v20 = vmax.f32 %v1329_v13, 0.0 }
 0x1fa   :  { %v699_v18 = vmax.f32 %v1330_v4, 0.0 }
 0x1fc   :  { %873 = vmatprep.mubr.f32.mxu1 %v699_v18 }
 0x1fd   :  { %874 = vmatmul.mubr.f32.vlgmr.msra.gmra.mrb[4].mxu1 %v698_v20 }
 0x1fe   :  { %1300 = vmatpush1.bf16.msra.mxu1 %v1299_v19  ;;  %944 = vmatprep.mubr.f32.mxu1 %v1340_v3  ;;  %v1307_v3 = vpack.c.bf16 %v775_v28, %v773_v27 }
 0x1ff   :  { %1302 = vmatprep.subr.bf16.mxu1 %v1301_v21 }
 0x202   :  { %1304 = vmatpush1.bf16.msra.mxu1 %v1303_v25 }
 0x203   :  { %1306 = vmatprep.subr.bf16.mxu1 %v1305_v26 }
 0x206   :  { %1308 = vmatpush1.bf16.msra.mxu1 %v1307_v3 }
 0x207   :  { %1310 = vmatprep.subr.bf16.mxu1 %v1309_v31 }
 0x20a   :  { %1312 = vmatpush1.bf16.msra.mxu1 %v1311_v35 }
 0x20b   :  { %1314 = vmatprep.subr.bf16.mxu1 %v1313_v36 }
 0x20e   :  { %1316 = vmatpush1.bf16.msra.mxu1 %v1315_v45 }
 0x20f   :  { %1318 = vmatprep.subr.bf16.mxu1 %v1317_v46 }
 0x212   :  { %1320 = vmatpush1.bf16.msra.mxu1 %v1319_v51 }
 0x213   :  { %1322 = vmatprep.subr.bf16.mxu1 %v1321_v52 }
 0x216   :  { %1324 = vmatpush1.bf16.msra.mxu1 %v1323_v57 }
 0x217   :  { %1326 = vmatprep.subr.bf16.mxu1 %v1325_v58 }
 0x21a   :  { %1328 = vmatpush1.bf16.msra.mxu1 %v1327_v61 }
 0x21d   :  { %945 = vmatmul.mubr.f32.vlgmr.msra.gmra.mrb[4].mxu1 %v700_v62 }
 0x2f0   :  { %v946_v5 = vpop.f32.mrb[4].mxu1 }
 0x2f1   :  { %v1331_v6 = vadd.f32 %v946_v5, %v802_v1  ;;  %v948_v7 = vpop.f32.mrb[5].mxu1 }
 0x2f2   :  { %v1332_v8 = vadd.f32 %v948_v7, %v806_v2 }
 0x2f3   :  { %953 = vst [vmem:[%s2334_s7] sm:$0xff] %v1331_v6 }
 0x2f4   :  { %v951_v10 = vmax.f32 %v1332_v8, -20.0 }
 0x2f6   :  { %v952_v11 = vmin.f32 %v951_v10, 2.0 }
 0x2f8   :  { %v954_v9 = vmul.f32 1.442695, %v952_v11 }
 0x2fa   :  { %1338 = vpow2.f32 %v954_v9 }
 0x304   :  { %v1339_v12 = vpop.eup %1338 }
 0x305   :  { %956 = vst [vmem:[%s2334_s7 + $0x8] sm:$0xff] %v1339_v12 }

</bundles_post_ra>
